<compile_context>
chip_gen: v7x
topology: tpu7x:2x2x1
jax: 0.10.0
libtpu: 0.0.40
codegen_flags: <defaults>
</compile_context>

<pallas_src>
import numpy as np
import jax
import jax.numpy as jnp
from jax import lax
from jax.experimental import pallas as pl
from jax.experimental.pallas import tpu as pltpu


# TODO(synk): clip_model.encode_image / encode_text, clip.tokenize and the
# string matching in _classify_captions_by_relation have no Pallas equivalent;
# they are replaced by precomputed feature inputs + an int32 relation_id array
# (and the per-relation first-caption indices derived from it).
def _ensemble_kernel(img_ref,     # VMEM (1, D)   f32  frozen CLIP image features
                     wproj_ref,   # VMEM (D, D)   f32  shared_projection.weight (natural out,in layout)
                     bproj_ref,   # VMEM (1, D)   f32  shared_projection.bias
                     txt_ref,     # VMEM (TN, D)  f32  caption features, this tile (host zero-padded)
                     txtf_ref,    # VMEM (R, D)   f32  features of the FIRST caption of each relation
                     headw_ref,   # VMEM (R, D)   f32  stacked relation-head weights
                     headb_ref,   # VMEM (R, 1)   f32  stacked relation-head biases
                     rel_ref,     # VMEM (1, TN)  i32  relation id per caption lane (-1 = none / padding)
                     out_ref):    # VMEM (1, TN)  f32  final scores for this tile
    f32 = jnp.float32
    TN, D = txt_ref.shape
    R = headw_ref.shape[0]
    contract_d = (((1,), (1,)), ((), ()))   # contract last dim of both operands (A @ B.T, no transposes)

    # shared_projection + F.normalize(dim=1, eps=1e-12) of the single image row.
    # Recomputed per tile (tiny, and it keeps tiles independent -> "parallel").
    proj = lax.dot_general(img_ref[...], wproj_ref[...], contract_d,
                           preferred_element_type=f32) + bproj_ref[...]                 # (1, D)
    img_n = proj * lax.rsqrt(jnp.maximum(jnp.sum(proj * proj, axis=1, keepdims=True), 1e-24))

    # Head score of the FIRST caption of each relation group (PyTorch broadcasting
    # quirk: every caption of a group gets this same additive term).
    pick = jnp.sum(headw_ref[...] * txtf_ref[...], axis=1, keepdims=True) + headb_ref[...]  # (R, 1)

    txt = txt_ref[...]                                                                   # (TN, D)
    # Raw similarity and per-caption squared norms as lane-dense rows (two M=1 MXU
    # calls); text normalization becomes a post-matmul row scale (EUP rsqrt), so the
    # normalized (TN, D) text matrix is never materialized.
    raw_sim = lax.dot_general(img_n, txt, contract_d, preferred_element_type=f32)        # (1, TN)
    ss_row = lax.dot_general(jnp.ones((1, D), f32), txt * txt, contract_d,
                             preferred_element_type=f32)                                 # (1, TN)
    sim = raw_sim * lax.rsqrt(jnp.maximum(ss_row, 1e-24))                                # (1, TN)

    # Map each caption lane to its relation's picked head score (vector-only select).
    rel_row = rel_ref[...]                                                               # (1, TN) i32
    r_iota = lax.broadcasted_iota(jnp.int32, (R, TN), 0)
    member = rel_row == r_iota                                                           # (R, TN)
    add_row = jnp.sum(jnp.where(member, pick, 0.0), axis=0, keepdims=True)               # (1, TN)

    out_ref[...] = jnp.where(rel_row >= 0, sim + add_row, 0.0)


def prepare_params(W_proj, b_proj, head_W, head_b):
    """One-time host-side parameter prep (hoisted out of the per-call path)."""
    return {
        "W_proj": jnp.asarray(W_proj, jnp.float32),                    # (D, D)
        "b_proj": jnp.asarray(b_proj, jnp.float32).reshape(1, -1),     # (1, D)
        "head_W": jnp.asarray(head_W, jnp.float32),                    # (R, D)
        "head_b": jnp.asarray(head_b, jnp.float32).reshape(-1, 1),     # (R, 1)
    }


@jax.jit
def ensemble_spatial_forward(params, image_features, text_features, relation_ids):
    """EnsembleSpatialModel.forward for a single image.

    image_features: (1, D)  frozen clip_model.encode_image(image) output
    text_features:  (N, D)  frozen clip_model.encode_text(caption) outputs
    relation_ids:   (N,) int32 in {-1, 0..R-1}; result of
                    _classify_captions_by_relation (-1 = matched no relation)
    Returns final_scores: (N,) float32.
    """
    B, D = image_features.shape
    assert B == 1, "the reference broadcasting semantics only hold for a single image"
    N = text_features.shape[0]
    R = params["head_W"].shape[0]

    NP = 128 * pl.cdiv(N, 128)                      # lane-dense padded caption count
    if NP % 512 == 0:                               # caption-axis tile (divides NP)
        TN = 512
    elif NP % 256 == 0:
        TN = 256
    else:
        TN = 128
    grid = (NP // TN,)

    img = jnp.asarray(image_features, jnp.float32)
    txt = jnp.asarray(text_features, jnp.float32)
    rel = jnp.asarray(relation_ids, jnp.int32)

    # Host-side (pre-kernel) prep: lane-dense padded text / relation rows and the
    # per-relation first-caption feature rows (relation classification is host work
    # anyway; relations with no caption get a dummy row that is never selected).
    txt_p = jnp.pad(txt, ((0, NP - N), (0, 0)))                                    # (NP, D)
    rel_p = jnp.pad(rel, (0, NP - N), constant_values=-1).reshape(1, NP)           # (1, NP)
    rel_eq = (rel[None, :] == jnp.arange(R, dtype=jnp.int32)[:, None]).astype(jnp.int32)
    firsts = jnp.argmax(rel_eq, axis=1)                                            # (R,)
    txt_first = jnp.take(txt, firsts, axis=0)                                      # (R, D)

    out = pl.pallas_call(
        _ensemble_kernel,
        grid_spec=pltpu.PrefetchScalarGridSpec(
            num_scalar_prefetch=0,
            grid=grid,
            in_specs=[
                pl.BlockSpec((1, D), lambda i: (0, 0)),        # image features
                pl.BlockSpec((D, D), lambda i: (0, 0)),        # shared_projection.weight
                pl.BlockSpec((1, D), lambda i: (0, 0)),        # shared_projection.bias
                pl.BlockSpec((TN, D), lambda i: (i, 0)),       # caption features, tiled
                pl.BlockSpec((R, D), lambda i: (0, 0)),        # first-caption features per relation
                pl.BlockSpec((R, D), lambda i: (0, 0)),        # head weights
                pl.BlockSpec((R, 1), lambda i: (0, 0)),        # head biases
                pl.BlockSpec((1, TN), lambda i: (0, i)),       # relation id per caption lane, tiled
            ],
            out_specs=pl.BlockSpec((1, TN), lambda i: (0, i)),
        ),
        out_shape=jax.ShapeDtypeStruct((1, NP), jnp.float32),
        compiler_params=pltpu.CompilerParams(dimension_semantics=("parallel",)),
    )(
        img, params["W_proj"], params["b_proj"], txt_p, txt_first,
        params["head_W"], params["head_b"], rel_p,
    )
    return out[0, :N]


def reference_forward(image_features, text_features, relation_ids,
                      W_proj, b_proj, head_W, head_b):
    """Pure numpy reference that mirrors the PyTorch code literally."""
    proj = image_features @ W_proj.T + b_proj
    img_n = proj / np.maximum(np.linalg.norm(proj, axis=1, keepdims=True), 1e-12)
    N = text_features.shape[0]
    final = np.zeros((N,), np.float32)
    rel = np.asarray(relation_ids)
    for r in range(head_W.shape[0]):
        indices = [i for i in range(N) if rel[i] == r]
        if not indices:
            continue
        rel_feat = text_features[np.array(indices)]
        rel_n = rel_feat / np.maximum(np.linalg.norm(rel_feat, axis=1, keepdims=True), 1e-12)
        similarity = img_n @ rel_n.T                                 # (1, n)
        head_scores = rel_feat @ head_W[r][:, None] + head_b[r]      # (n, 1)
        combined = similarity + head_scores                          # broadcast -> (n, n)
        for i, idx in enumerate(indices):
            final[idx] = combined[0, i]
    return final


if __name__ == "__main__":
    key = jax.random.PRNGKey(0)
    (k_img, k_txt, k_wproj, k_head, k_b1, k_b2,
     k_img2, k_txt2, k_rel2) = jax.random.split(key, 9)

    D = 128   # embed_dim (clip_model.visual.output_dim)
    N = 8     # number of caption options
    R = 4     # relation heads: left_of, on, right_of, under

    # "encoder outputs" (frozen CLIP encoders abstracted away)
    image_features = jax.random.normal(k_img, (1, D), dtype=jnp.float32)
    text_features = jax.random.normal(k_txt, (N, D), dtype=jnp.float32)
    relation_ids = jnp.array([0, 1, 2, 3, 0, 1, -1, 2], dtype=jnp.int32)

    # parameters; weights initialised like the module (N(0, 0.02)); biases made
    # non-zero (as after fine-tuning) to exercise the bias paths.
    W_proj = 0.02 * jax.random.normal(k_wproj, (D, D), dtype=jnp.float32)
    b_proj = 0.02 * jax.random.normal(k_b1, (D,), dtype=jnp.float32)
    head_W = 0.02 * jax.random.normal(k_head, (R, D), dtype=jnp.float32)
    head_b = 0.02 * jax.random.normal(k_b2, (R,), dtype=jnp.float32)

    params = prepare_params(W_proj, b_proj, head_W, head_b)   # one-time prep (hoisted)

    # --- small config (single tile) ---
    out = ensemble_spatial_forward(params, image_features, text_features, relation_ids)
    out = jax.block_until_ready(out)
    ref = reference_forward(np.asarray(image_features), np.asarray(text_features),
                            np.asarray(relation_ids), np.asarray(W_proj),
                            np.asarray(b_proj), np.asarray(head_W), np.asarray(head_b))
    assert np.allclose(np.asarray(out), ref, atol=1e-4, rtol=1e-4), (np.asarray(out), ref)

    # --- larger config (multi-tile grid over the caption axis) ---
    N2 = 300
    image_features2 = jax.random.normal(k_img2, (1, D), dtype=jnp.float32)
    text_features2 = jax.random.normal(k_txt2, (N2, D), dtype=jnp.float32)
    relation_ids2 = jax.random.randint(k_rel2, (N2,), -1, R).astype(jnp.int32)
    out2 = ensemble_spatial_forward(params, image_features2, text_features2, relation_ids2)
    out2 = jax.block_until_ready(out2)
    ref2 = reference_forward(np.asarray(image_features2), np.asarray(text_features2),
                             np.asarray(relation_ids2), np.asarray(W_proj),
                             np.asarray(b_proj), np.asarray(head_W), np.asarray(head_b))
    assert np.allclose(np.asarray(out2), ref2, atol=1e-4, rtol=1e-4), (np.asarray(out2), ref2)

    print("KERNEL_OK")
</pallas_src>

<mosaic_0001>
module attributes {stable_mosaic.version = 11 : i64} {
  func.func @_ensemble_kernel(%arg0: i32, %arg1: memref<1x128xf32, #tpu.memory_space<vmem>>, %arg2: memref<128x128xf32, #tpu.memory_space<vmem>>, %arg3: memref<1x128xf32, #tpu.memory_space<vmem>>, %arg4: memref<128x128xf32, #tpu.memory_space<vmem>>, %arg5: memref<4x128xf32, #tpu.memory_space<vmem>>, %arg6: memref<4x128xf32, #tpu.memory_space<vmem>>, %arg7: memref<4x1xf32, #tpu.memory_space<vmem>>, %arg8: memref<1x128xi32, #tpu.memory_space<vmem>>, %arg9: memref<1x128xf32, #tpu.memory_space<vmem>>) attributes {dimension_semantics = [#tpu.dimension_semantics<parallel>], iteration_bounds = array<i64: 1>, scalar_prefetch = 0 : i64, scratch_operands = 0 : i64, tpu.core_type = #tpu.core_type<tc>, window_params = [{pipeline_mode = #tpu.pipeline_mode<synchronous>, transform_indices = @transform_0, window_bounds = array<i64: 1, 128>}, {pipeline_mode = #tpu.pipeline_mode<synchronous>, transform_indices = @transform_1, window_bounds = array<i64: 128, 128>}, {pipeline_mode = #tpu.pipeline_mode<synchronous>, transform_indices = @transform_2, window_bounds = array<i64: 1, 128>}, {transform_indices = @transform_3, window_bounds = array<i64: 128, 128>}, {pipeline_mode = #tpu.pipeline_mode<synchronous>, transform_indices = @transform_4, window_bounds = array<i64: 4, 128>}, {pipeline_mode = #tpu.pipeline_mode<synchronous>, transform_indices = @transform_5, window_bounds = array<i64: 4, 128>}, {pipeline_mode = #tpu.pipeline_mode<synchronous>, transform_indices = @transform_6, window_bounds = array<i64: 4, 1>}, {transform_indices = @transform_7, window_bounds = array<i64: 1, 128>}, {transform_indices = @transform_8, window_bounds = array<i64: 1, 128>}]} {
    %c0 = arith.constant 0 : index
    %c0_0 = arith.constant 0 : index
    %0 = vector.load %arg1[%c0, %c0_0] : memref<1x128xf32, #tpu.memory_space<vmem>>, vector<1x128xf32>
    %c0_1 = arith.constant 0 : index
    %c0_2 = arith.constant 0 : index
    %1 = vector.load %arg2[%c0_1, %c0_2] : memref<128x128xf32, #tpu.memory_space<vmem>>, vector<128x128xf32>
    %cst = arith.constant dense<0.000000e+00> : vector<1x128xf32>
    %2 = tpu.matmul %0, %1, %cst {dimension_numbers = #tpu.dot_dimension_numbers<[1], [1], [0], [0], [0, 0, 1, 0], [], []>} : vector<1x128xf32>, vector<128x128xf32>, vector<1x128xf32> -> vector<1x128xf32>
    %c0_3 = arith.constant 0 : index
    %c0_4 = arith.constant 0 : index
    %3 = vector.load %arg3[%c0_3, %c0_4] : memref<1x128xf32, #tpu.memory_space<vmem>>, vector<1x128xf32>
    %4 = arith.addf %2, %3 : vector<1x128xf32>
    %5 = arith.mulf %4, %4 : vector<1x128xf32>
    %cst_5 = arith.constant dense<0.000000e+00> : vector<1xf32>
    %6 = vector.multi_reduction <add>, %5, %cst_5 [1] : vector<1x128xf32> to vector<1xf32>
    %7 = vector.shape_cast %6 : vector<1xf32> to vector<1x1xf32>
    %cst_6 = arith.constant 1.000000e-24 : f32
    %8 = vector.broadcast %cst_6 : f32 to vector<1x1xf32>
    %9 = arith.maximumf %7, %8 : vector<1x1xf32>
    %10 = math.rsqrt %9 : vector<1x1xf32>
    %11 = vector.broadcast %10 : vector<1x1xf32> to vector<1x128xf32>
    %12 = arith.mulf %4, %11 : vector<1x128xf32>
    %c0_7 = arith.constant 0 : index
    %c0_8 = arith.constant 0 : index
    %13 = vector.load %arg6[%c0_7, %c0_8] : memref<4x128xf32, #tpu.memory_space<vmem>>, vector<4x128xf32>
    %c0_9 = arith.constant 0 : index
    %c0_10 = arith.constant 0 : index
    %14 = vector.load %arg5[%c0_9, %c0_10] : memref<4x128xf32, #tpu.memory_space<vmem>>, vector<4x128xf32>
    %15 = arith.mulf %13, %14 : vector<4x128xf32>
    %cst_11 = arith.constant dense<0.000000e+00> : vector<4xf32>
    %16 = vector.multi_reduction <add>, %15, %cst_11 [1] : vector<4x128xf32> to vector<4xf32>
    %17 = vector.shape_cast %16 : vector<4xf32> to vector<4x1xf32>
    %c0_12 = arith.constant 0 : index
    %c0_13 = arith.constant 0 : index
    %18 = vector.load %arg7[%c0_12, %c0_13] : memref<4x1xf32, #tpu.memory_space<vmem>>, vector<4x1xf32>
    %19 = arith.addf %17, %18 : vector<4x1xf32>
    %c0_14 = arith.constant 0 : index
    %c0_15 = arith.constant 0 : index
    %20 = vector.load %arg4[%c0_14, %c0_15] : memref<128x128xf32, #tpu.memory_space<vmem>>, vector<128x128xf32>
    %cst_16 = arith.constant dense<0.000000e+00> : vector<1x128xf32>
    %21 = tpu.matmul %12, %20, %cst_16 {dimension_numbers = #tpu.dot_dimension_numbers<[1], [1], [0], [0], [0, 0, 1, 0], [], []>} : vector<1x128xf32>, vector<128x128xf32>, vector<1x128xf32> -> vector<1x128xf32>
    %cst_17 = arith.constant 1.000000e+00 : f32
    %22 = vector.broadcast %cst_17 : f32 to vector<1x128xf32>
    %23 = arith.mulf %20, %20 : vector<128x128xf32>
    %cst_18 = arith.constant dense<0.000000e+00> : vector<1x128xf32>
    %24 = tpu.matmul %22, %23, %cst_18 {dimension_numbers = #tpu.dot_dimension_numbers<[1], [1], [0], [0], [0, 0, 1, 0], [], []>} : vector<1x128xf32>, vector<128x128xf32>, vector<1x128xf32> -> vector<1x128xf32>
    %cst_19 = arith.constant 1.000000e-24 : f32
    %25 = vector.broadcast %cst_19 : f32 to vector<1x128xf32>
    %26 = arith.maximumf %24, %25 : vector<1x128xf32>
    %27 = math.rsqrt %26 : vector<1x128xf32>
    %28 = arith.mulf %21, %27 : vector<1x128xf32>
    %c0_20 = arith.constant 0 : index
    %c0_21 = arith.constant 0 : index
    %29 = vector.load %arg8[%c0_20, %c0_21] : memref<1x128xi32, #tpu.memory_space<vmem>>, vector<1x128xi32>
    %30 = tpu.iota {dimensions = array<i32: 0>} : vector<4x128xi32>
    %31 = vector.broadcast %29 : vector<1x128xi32> to vector<4x128xi32>
    %32 = arith.cmpi eq, %31, %30 : vector<4x128xi32>
    %cst_22 = arith.constant 0.000000e+00 : f32
    %33 = vector.shape_cast %19 : vector<4x1xf32> to vector<4x1xf32>
    %34 = vector.broadcast %33 : vector<4x1xf32> to vector<4x128xf32>
    %35 = vector.broadcast %cst_22 : f32 to vector<4x128xf32>
    %36 = arith.select %32, %34, %35 : vector<4x128xi1>, vector<4x128xf32>
    %cst_23 = arith.constant dense<0.000000e+00> : vector<128xf32>
    %37 = vector.multi_reduction <add>, %36, %cst_23 [0] : vector<4x128xf32> to vector<128xf32>
    %38 = vector.shape_cast %37 : vector<128xf32> to vector<1x128xf32>
    %c0_i32 = arith.constant 0 : i32
    %39 = vector.broadcast %c0_i32 : i32 to vector<1x128xi32>
    %40 = arith.cmpi sge, %29, %39 : vector<1x128xi32>
    %41 = arith.addf %28, %38 : vector<1x128xf32>
    %cst_24 = arith.constant 0.000000e+00 : f32
    %42 = vector.broadcast %cst_24 : f32 to vector<1x128xf32>
    %43 = arith.select %40, %41, %42 : vector<1x128xi1>, vector<1x128xf32>
    %c0_25 = arith.constant 0 : index
    %c0_26 = arith.constant 0 : index
    %44 = vector.load %arg9[%c0_25, %c0_26] : memref<1x128xf32, #tpu.memory_space<vmem>>, vector<1x128xf32>
    tpu.vector_store %arg9[%c0_25, %c0_26], %43 {strides = array<i32>} : memref<1x128xf32, #tpu.memory_space<vmem>>, vector<1x128xf32>,
    return
  }
  func.func @transform_0(%arg0: i32) -> (i32, i32) {
    %c0_i32 = arith.constant 0 : i32
    %c0_i32_0 = arith.constant 0 : i32
    %c0_i32_1 = arith.constant 0 : i32
    return %c0_i32, %c0_i32_0 : i32, i32
  }
  func.func @transform_1(%arg0: i32) -> (i32, i32) {
    %c0_i32 = arith.constant 0 : i32
    %c0_i32_0 = arith.constant 0 : i32
    %c0_i32_1 = arith.constant 0 : i32
    return %c0_i32, %c0_i32_0 : i32, i32
  }
  func.func @transform_2(%arg0: i32) -> (i32, i32) {
    %c0_i32 = arith.constant 0 : i32
    %c0_i32_0 = arith.constant 0 : i32
    %c0_i32_1 = arith.constant 0 : i32
    return %c0_i32, %c0_i32_0 : i32, i32
  }
  func.func @transform_3(%arg0: i32) -> (i32, i32) {
    %c0_i32 = arith.constant 0 : i32
    %c0_i32_0 = arith.constant 0 : i32
    return %arg0, %c0_i32 : i32, i32
  }
  func.func @transform_4(%arg0: i32) -> (i32, i32) {
    %c0_i32 = arith.constant 0 : i32
    %c0_i32_0 = arith.constant 0 : i32
    %c0_i32_1 = arith.constant 0 : i32
    return %c0_i32, %c0_i32_0 : i32, i32
  }
  func.func @transform_5(%arg0: i32) -> (i32, i32) {
    %c0_i32 = arith.constant 0 : i32
    %c0_i32_0 = arith.constant 0 : i32
    %c0_i32_1 = arith.constant 0 : i32
    return %c0_i32, %c0_i32_0 : i32, i32
  }
  func.func @transform_6(%arg0: i32) -> (i32, i32) {
    %c0_i32 = arith.constant 0 : i32
    %c0_i32_0 = arith.constant 0 : i32
    %c0_i32_1 = arith.constant 0 : i32
    return %c0_i32, %c0_i32_0 : i32, i32
  }
  func.func @transform_7(%arg0: i32) -> (i32, i32) {
    %c0_i32 = arith.constant 0 : i32
    %c0_i32_0 = arith.constant 0 : i32
    return %c0_i32, %arg0 : i32, i32
  }
  func.func @transform_8(%arg0: i32) -> (i32, i32) {
    %c0_i32 = arith.constant 0 : i32
    %c0_i32_0 = arith.constant 0 : i32
    return %c0_i32, %arg0 : i32, i32
  }
}

</mosaic_0001>

<bundles_post_ra>
// kernel: ensemble_spatial_forward.1
= control target key start
LH: loop header
LB: loop body
LE: loop exit
PB: predicated region body
PF: predicated region fallthrough
CT: control target
= control target key end

     0   :  { %v577_v0 = vmov 0.0|0.0   ;;  %vm578_vm0 = vmmov 0   ;;  %v579_v3 = vmov 0.0   ;;  %vm118_vm1 = vcmask 1040384   ;;  %s773_s1 = inlined_call_operand.vmem [shape: f32[128,128], index: 1, kind: input, shape index: {}]   ;;  %s774_s0 = inlined_call_operand.vmem [shape: f32[1,128], index: 0, kind: input, shape index: {}]   ;;  %s775_s3 = inlined_call_operand.vmem [shape: f32[128,128], index: 3, kind: input, shape index: {}]   ;;  %s776_s2 = inlined_call_operand.vmem [shape: f32[1,128], index: 2, kind: input, shape index: {}]   ;;  %s777_s4 = inlined_call_operand.vmem [shape: f32[4,128], index: 4, kind: input, shape index: {}]   ;;  %s778_s5 = inlined_call_operand.vmem [shape: f32[4,128], index: 5, kind: input, shape index: {}]   ;;  %s779_s6 = inlined_call_operand.vmem [shape: f32[4,1], index: 6, kind: input, shape index: {}]   ;;  %s780_s7 = inlined_call_operand.vmem [shape: s32[1,128], index: 7, kind: input, shape index: {}]   ;;  %s781_s8 = inlined_call_operand.vmem [shape: f32[1,128], index: 8, kind: output, shape index: {}]  }
   0x1   :  { %494 = vmatprep.subr.bf16.mxu0 %v577_v0  ;;  %v30_v1 = vld [vmem:[%s773_s1] sm:$0xff]  ;;  %v31_v2 = vld [vmem:[%s773_s1 + $0x8] sm:$0xff]  ;;  %421 = vmatprep.mubr.msk.f32.mxu0 %vm578_vm0, %v579_v3  ;;  %v32_v5 = vld [vmem:[%s773_s1 + $0x10] sm:$0xff]  ;;  %vm128_vm2 = vcmask 1043456  }
   0x2   :  { %v495_v4 = vpack.c.bf16 %v31_v2, %v30_v1  ;;  %518 = vmatprep.subr.bf16.mxu1 %v577_v0  ;;  %456 = vmatprep.mubr.msk.f32.mxu1 %vm578_vm0, %v579_v3  ;;  %v33_v6 = vld [vmem:[%s773_s1 + $0x18] sm:$0xff]  ;;  %v34_v8 = vld [vmem:[%s773_s1 + $0x20] sm:$0xff]  ;;  %v35_v9 = vld [vmem:[%s773_s1 + $0x28] sm:$0xff] }
   0x3   :  { %v498_v7 = vpack.c.bf16 %v33_v6, %v32_v5  ;;  %v501_v10 = vpack.c.bf16 %v35_v9, %v34_v8  ;;  %v36_v11 = vld [vmem:[%s773_s1 + $0x30] sm:$0xff]  ;;  %v37_v12 = vld [vmem:[%s773_s1 + $0x38] sm:$0xff]  ;;  %v38_v14 = vld [vmem:[%s773_s1 + $0x40] sm:$0xff] }
   0x4   :  { %496 = vmatpush3.bf16.xpose.msra.mxu0 %v495_v4  ;;  %v504_v13 = vpack.c.bf16 %v37_v12, %v36_v11  ;;  %v39_v15 = vld [vmem:[%s773_s1 + $0x48] sm:$0xff]  ;;  %v40_v17 = vld [vmem:[%s773_s1 + $0x50] sm:$0xff]  ;;  %v41_v18 = vld [vmem:[%s773_s1 + $0x58] sm:$0xff] }
   0x5   :  { %497 = vmatprep.subr.bf16.mxu0 %v577_v0  ;;  %v507_v16 = vpack.c.bf16 %v39_v15, %v38_v14  ;;  %v510_v19 = vpack.c.bf16 %v41_v18, %v40_v17  ;;  %v42_v20 = vld [vmem:[%s773_s1 + $0x60] sm:$0xff]  ;;  %v43_v21 = vld [vmem:[%s773_s1 + $0x68] sm:$0xff]  ;;  %v44_v23 = vld [vmem:[%s773_s1 + $0x70] sm:$0xff] }
   0x6   :  { %v513_v22 = vpack.c.bf16 %v43_v21, %v42_v20  ;;  %v45_v24 = vld [vmem:[%s773_s1 + $0x78] sm:$0xff]  ;;  %v29_v26 = vld [vmem:[%s774_s0] sm:$0x1]  ;;  %v135_v28 = vld [vmem:[%s775_s3 + $0x8] sm:$0xff]  ;;  %v580_v21 = vmov 1.0  }
   0x7   :  { %v516_v25 = vpack.c.bf16 %v45_v24, %v44_v23  ;;  %v134_v27 = vld [vmem:[%s775_s3] sm:$0xff]  ;;  %v221_v30 = vmul.f32 %v135_v28, %v135_v28  ;;  %v136_v32 = vld [vmem:[%s775_s3 + $0x10] sm:$0xff]  ;;  %v137_v33 = vld [vmem:[%s775_s3 + $0x18] sm:$0xff]  ;;  %v581_v23 = vmov 0  }
   0x8   :  { %v220_v29 = vmul.f32 %v134_v27, %v134_v27  ;;  %v519_v31 = vpack.c.bf16 %v135_v28, %v134_v27  ;;  %v222_v35 = vmul.f32 %v136_v32, %v136_v32  ;;  %v223_v36 = vmul.f32 %v137_v33, %v137_v33  ;;  %v138_v39 = vld [vmem:[%s775_s3 + $0x20] sm:$0xff]  ;;  %v139_v40 = vld [vmem:[%s775_s3 + $0x28] sm:$0xff]  ;;  %v140_v45 = vld [vmem:[%s775_s3 + $0x30] sm:$0xff]  ;;  %571 = vset.pattern.permute.xlu1 %v581_v23 }
   0x9   :  { %v522_v37 = vpack.c.bf16 %v137_v33, %v136_v32  ;;  %v224_v41 = vmul.f32 %v138_v39, %v138_v39  ;;  %v225_v42 = vmul.f32 %v139_v40, %v139_v40  ;;  %v525_v43 = vpack.c.bf16 %v139_v40, %v138_v39  ;;  %v141_v46 = vld [vmem:[%s775_s3 + $0x38] sm:$0xff]  ;;  %v142_v51 = vld [vmem:[%s775_s3 + $0x40] sm:$0xff]  ;;  %v143_v52 = vld [vmem:[%s775_s3 + $0x48] sm:$0xff]  ;;  %572 = vset.pattern.permute.xlu0 %v581_v23 }
   0xa   :  { %v543_v34 = vpack.c.bf16 %v221_v30, %v220_v29  ;;  %520 = vmatpush3.bf16.xpose.msra.mxu1 %v519_v31  ;;  %v546_v38 = vpack.c.bf16 %v223_v36, %v222_v35  ;;  %v226_v47 = vmul.f32 %v140_v45, %v140_v45  ;;  %v227_v48 = vmul.f32 %v141_v46, %v141_v46  ;;  %v144_v57 = vld [vmem:[%s775_s3 + $0x50] sm:$0xff]  ;;  %v145_v58 = vld [vmem:[%s775_s3 + $0x58] sm:$0xff]  ;;  %v146_v63 = vld [vmem:[%s775_s3 + $0x60] sm:$0xff] }
   0xb   :  { %521 = vmatprep.subr.bf16.mxu1 %v577_v0  ;;  %v549_v44 = vpack.c.bf16 %v225_v42, %v224_v41  ;;  %v528_v49 = vpack.c.bf16 %v141_v46, %v140_v45  ;;  %v228_v53 = vmul.f32 %v142_v51, %v142_v51  ;;  %v229_v54 = vmul.f32 %v143_v52, %v143_v52  ;;  %v147_v1 = vld [vmem:[%s775_s3 + $0x68] sm:$0xff]  ;;  %v148_v5 = vld [vmem:[%s775_s3 + $0x70] sm:$0xff]  ;;  %v149_v6 = vld [vmem:[%s775_s3 + $0x78] sm:$0xff] }
   0xc   :  { %499 = vmatpush3.bf16.xpose.msra.mxu0 %v498_v7  ;;  %v552_v50 = vpack.c.bf16 %v227_v48, %v226_v47  ;;  %v531_v55 = vpack.c.bf16 %v143_v52, %v142_v51  ;;  %v230_v59 = vmul.f32 %v144_v57, %v144_v57  ;;  %v231_v60 = vmul.f32 %v145_v58, %v145_v58  ;;  %v125_v12 = vld [vmem:[%s778_s5] sm:$0xf] }
   0xd   :  { %500 = vmatprep.subr.bf16.mxu0 %v577_v0  ;;  %v555_v56 = vpack.c.bf16 %v229_v54, %v228_v53  ;;  %v534_v61 = vpack.c.bf16 %v145_v58, %v144_v57  ;;  %v232_v2 = vmul.f32 %v146_v63, %v146_v63  ;;  %v234_v7 = vmul.f32 %v148_v5, %v148_v5  ;;  %v309_v35 = vld [vmem:[%s780_s7] sm:$0x1] }
   0xe   :  { %v558_v62 = vpack.c.bf16 %v231_v60, %v230_v59  ;;  %v235_v8 = vmul.f32 %v149_v6, %v149_v6  ;;  %v537_v20 = vpack.c.bf16 %v147_v1, %v146_v63  ;;  %v310_v32 = vlaneseq }
   0xf   :  { %vm330_vm4 = vcmp.ge.s32.totalorder %v309_v35, 0 }
  0x10   :  { %v564_v9 = vpack.c.bf16 %v235_v8, %v234_v7  ;;  %v311_v33 = vshrl.u32 %v310_v32, 7 }
  0x12   :  { %523 = vmatpush3.bf16.xpose.msra.mxu1 %v522_v37 }
  0x13   :  { %524 = vmatprep.subr.bf16.mxu1 %v577_v0 }
  0x14   :  { %502 = vmatpush3.bf16.xpose.msra.mxu0 %v501_v10  ;;  %v46_v10 = vld [vmem:[%s776_s2] sm:$0x1] }
  0x15   :  { %503 = vmatprep.subr.bf16.mxu0 %v577_v0 }
  0x1a   :  { %526 = vmatpush3.bf16.xpose.msra.mxu1 %v525_v43 }
  0x1b   :  { %527 = vmatprep.subr.bf16.mxu1 %v577_v0 }
  0x1c   :  { %505 = vmatpush3.bf16.xpose.msra.mxu0 %v504_v13  ;;  %v126_v13 = vld [vmem:[%s777_s4] sm:$0xf] }
  0x1d   :  { %506 = vmatprep.subr.bf16.mxu0 %v577_v0  ;;  %v127_v17 = vmul.f32 %v126_v13, %v125_v12 }
  0x22   :  { %529 = vmatpush3.bf16.xpose.msra.mxu1 %v528_v49 }
  0x23   :  { %530 = vmatprep.subr.bf16.mxu1 %v577_v0 }
  0x24   :  { %508 = vmatpush3.bf16.xpose.msra.mxu0 %v507_v16 }
  0x25   :  { %509 = vmatprep.subr.bf16.mxu0 %v577_v0 }
  0x2a   :  { %532 = vmatpush3.bf16.xpose.msra.mxu1 %v531_v55 }
  0x2b   :  { %533 = vmatprep.subr.bf16.mxu1 %v577_v0 }
  0x2c   :  { %511 = vmatpush3.bf16.xpose.msra.mxu0 %v510_v19  ;;  %v129_v19 = vsel %vm128_vm2, %v127_v17, 0.0 }
  0x2d   :  { %512 = vmatprep.subr.bf16.mxu0 %v577_v0 }
  0x32   :  { %535 = vmatpush3.bf16.xpose.msra.mxu1 %v534_v61 }
  0x33   :  { %536 = vmatprep.subr.bf16.mxu1 %v577_v0 }
  0x34   :  { %514 = vmatpush3.bf16.xpose.msra.mxu0 %v513_v22  ;;  %v540_v22 = vpack.c.bf16 %v149_v6, %v148_v5 }
  0x35   :  { %515 = vmatprep.subr.bf16.mxu0 %v577_v0 }
  0x3a   :  { %538 = vmatpush3.bf16.xpose.msra.mxu1 %v537_v20 }
  0x3b   :  { %539 = vmatprep.subr.bf16.mxu1 %v577_v0 }
  0x3c   :  { %517 = vmatpush3.bf16.xpose.msra.mxu0 %v516_v25 }
  0x3d   :  { %542 = vmatprep.subr.bf16.mxu0 %v577_v0 }
  0x42   :  { %541 = vmatpush3.bf16.xpose.msra.mxu1 %v540_v22 }
  0x43   :  { %422 = vmatmul.mubr.f32.vlgmr.msra.gmra.mrb[0].mxu0 %v29_v26  ;;  %v132_v26 = vld [vmem:[%s779_s6] sm:$0xf] }
  0x44   :  { %491 = vmatprep.mubr.msk.f32.mxu0 %vm578_vm0, %v579_v3  ;;  %544 = vmatpush3.bf16.xpose.msra.mxu0 %v543_v34  ;;  %v233_v3 = vmul.f32 %v147_v1, %v147_v1  ;;  %v314_v34 = vsub.s32 0, %v311_v33 }
  0x45   :  { %545 = vmatprep.subr.bf16.mxu0 %v577_v0 }
  0x46   :  { %v561_v4 = vpack.c.bf16 %v233_v3, %v232_v2  ;;  %v315_v36 = vrot.slane %v309_v35, %v314_v34 }
  0x48   :  { %vm316_vm3 = vcmp.eq.s32.totalorder %v315_v36, %v311_v33 }
  0x4c   :  { %547 = vmatpush3.bf16.xpose.msra.mxu0 %v546_v38 }
  0x4d   :  { %548 = vmatprep.subr.bf16.mxu0 %v577_v0 }
  0x54   :  { %550 = vmatpush3.bf16.xpose.msra.mxu0 %v549_v44 }
  0x55   :  { %551 = vmatprep.subr.bf16.mxu0 %v577_v0 }
  0x5c   :  { %553 = vmatpush3.bf16.xpose.msra.mxu0 %v552_v50 }
  0x5d   :  { %554 = vmatprep.subr.bf16.mxu0 %v577_v0 }
  0x64   :  { %556 = vmatpush3.bf16.xpose.msra.mxu0 %v555_v56 }
  0x65   :  { %557 = vmatprep.subr.bf16.mxu0 %v577_v0 }
  0x6c   :  { %559 = vmatpush3.bf16.xpose.msra.mxu0 %v558_v62 }
  0x6d   :  { %560 = vmatprep.subr.bf16.mxu0 %v577_v0 }
  0x74   :  { %562 = vmatpush3.bf16.xpose.msra.mxu0 %v561_v4 }
  0x75   :  { %563 = vmatprep.subr.bf16.mxu0 %v577_v0 }
  0x7c   :  { %565 = vmatpush3.bf16.xpose.msra.mxu0 %v564_v9 }
  0x83   :  { %492 = vmatmul.mubr.f32.vlgmr.msra.gmra.mrb[2].mxu0 %v580_v21 }
 0x116   :  { %v113_v11 = vpop.f32.mrb[0].mxu0 }
 0x117   :  { %v114_v14 = vadd.f32 %v113_v11, %v46_v10  ;;  %v423_v15 = vpop.f32.mrb[1].mxu0 }
 0x119   :  { %v117_v16 = vmul.f32 %v114_v14, %v114_v14 }
 0x11b   :  { %v119_v18 = vsel %vm118_vm1, %v117_v16, 0.0 }
 0x11c   :  { %120 = vadd.xlane.f32.xlu0 %v119_v18 }
 0x120   :  { %130 = vadd.xlane.f32.xlu0 %v129_v19 }
 0x156   :  { %v302_v31 = vpop.f32.mrb[2].mxu0 }
 0x157   :  { %v493_v0 = vpop.f32.mrb[3].mxu0  ;;  %v306_v41 = vmax.f32 %v302_v31, 1e-24 }
 0x1a9   :  { %v121_v24 = vpop.xlane.xlu0 %120 }
 0x1aa   :  { %v122_v25 = vmax.f32 %v121_v24, 1e-24 }
 0x1ac   :  { %573 = vrsqrt.f32 %v122_v25 }
 0x1ad   :  { %v131_v27 = vpop.xlane.xlu0 %130  ;;  %575 = vrsqrt.f32 %v306_v41 }
 0x1ae   :  { %v133_v28 = vadd.f32 %v132_v26, %v131_v27 }
 0x1b0   :  { %319 = vperm.xlu1 %571, %v133_v28  }
 0x1b6   :  { %v574_v29 = vpop.eup %573 }
 0x1b7   :  { %v124_v30 = vmul.f32 %v574_v29, %v114_v14  ;;  %v576_v46 = vpop.eup %575 }
 0x1b9   :  { %457 = vmatmul.mubr.f32.vlgmr.msra.gmra.mrb[0].mxu1 %v124_v30 }
 0x22f   :  { %v320_v37 = vpop.permute.xlu1 %319 }
 0x230   :  { %v322_v38 = vsel %vm316_vm3, %v320_v37, 0.0 }
 0x231   :  { %v323_v39 = vsel %vm128_vm2, %v322_v38, 0.0 }
 0x232   :  { %v324_v40 = vrot.slane %v323_v39, 4 }
 0x234   :  { %v325_v42 = vadd.f32 %v324_v40, %v323_v39 }
 0x236   :  { %v326_v43 = vrot.slane %v325_v42, 2 }
 0x238   :  { %v327_v44 = vadd.f32 %v326_v43, %v325_v42 }
 0x23a   :  { %v328_v45 = vrot.slane %v327_v44, 1 }
 0x23c   :  { %v329_v49 = vadd.f32 %v328_v45, %v327_v44 }
 0x28c   :  { %v216_v47 = vpop.f32.mrb[0].mxu1 }
 0x28d   :  { %v308_v48 = vmul.f32 %v576_v46, %v216_v47  ;;  %v458_v50 = vpop.f32.mrb[1].mxu1 }
 0x28f   :  { %v331_v51 = vadd.f32 %v329_v49, %v308_v48 }
 0x291   :  { %v332_v52 = vsel %vm330_vm4, %v331_v51, 0.0 }
 0x292   :  { %333 = vst [vmem:[%s781_s8] sm:$0x1] %v332_v52 }

</bundles_post_ra>
